<compile_context>
chip_gen: v5e
topology: v5e:2x2
jax: 0.10.0
libtpu: 0.0.40
codegen_flags: <defaults>
</compile_context>

<pallas_src>
import functools
import math

import jax
import jax.numpy as jnp
from jax import lax
from jax.experimental import pallas as pl
from jax.experimental.pallas import tpu as pltpu


def _round_up(x, m):
    return ((x + m - 1) // m) * m


def _mix32(x):
    """lowbias32-style integer hash, uint32 -> uint32 (used for the dropout mask)."""
    x = x ^ (x >> 16)
    x = x * jnp.uint32(0x7FEB352D)
    x = x ^ (x >> 15)
    x = x * jnp.uint32(0x846CA68B)
    x = x ^ (x >> 16)
    return x


# ----------------------------------------------------------------------------
# Fused bidirectional-GRU + dropout kernel
# ----------------------------------------------------------------------------
def _bigru_kernel(seed_ref,                       # scalar prefetch (SMEM)
                  x_ref,                          # (T, B_tile, I)   bf16
                  wih_ref,                        # (I, 6*Hp)        bf16  [fwd r|z|n | bwd r|z|n]
                  whh_f_ref, whh_b_ref,           # (Hp, 3*Hp)       bf16
                  gib_ref,                        # (1, 6*Hp)        f32   b_ih + b_hh(r,z) folded
                  bhhn_ref,                       # (1, 2*Hp)        f32   b_hn fwd | bwd
                  out_ref,                        # (T, B_tile, 2*Hp) f32
                  gi_ref, h_f, h_b,               # VMEM scratch
                  *, apply_dropout: bool):
    T, B_tile, I = x_ref.shape
    Hp = out_ref.shape[2] // 2
    B_pad = B_tile * pl.num_programs(0)
    batch_off = pl.program_id(0) * B_tile

    # ---- hoisted input projection: ONE big MXU matmul for every timestep and both
    # directions.  Input biases (+ recurrent r/z biases) are pre-folded into gib.
    x2d = x_ref[...].reshape(T * B_tile, I)                              # bf16
    gi_ref[...] = (jnp.dot(x2d, wih_ref[...],
                           preferred_element_type=jnp.float32)
                   + gib_ref[...])                                       # (T*B, 6*Hp) f32

    h_f[...] = jnp.zeros_like(h_f)
    h_b[...] = jnp.zeros_like(h_b)

    # Hoisted small bias loads (the 'n'-gate recurrent bias must stay inside r*(.)).
    bhh_n_f = bhhn_ref[:, :Hp]                                           # (1, Hp)
    bhh_n_b = bhhn_ref[:, Hp:]

    if apply_dropout:
        seed_u = seed_ref[0].astype(jnp.uint32) * jnp.uint32(0x9E3779B9)
        rows = lax.broadcasted_iota(jnp.int32, (B_tile, Hp), 0).astype(jnp.uint32)
        cols = lax.broadcasted_iota(jnp.int32, (B_tile, Hp), 1).astype(jnp.uint32)

    def maybe_drop(v, t_idx, lane_off):
        # Dropout(p=0.5) fused into the output store; deterministic counter hash
        # over the global (t, batch, feature) index so every tile/step gets a
        # distinct mask.  VPU-only work, hidden under the MXU.
        if not apply_dropout:
            return v
        base = (t_idx * B_pad + batch_off).astype(jnp.uint32)
        gidx = (base + rows) * jnp.uint32(2 * Hp) + jnp.uint32(lane_off) + cols
        bits = _mix32(gidx ^ seed_u)
        keep = (bits & jnp.uint32(1)) == jnp.uint32(0)                   # p(keep)=0.5
        return jnp.where(keep, v * 2.0, 0.0)                             # scale 1/(1-p)

    def cell(g, h_prev, whh_ref, bhh_n):
        # g already contains x@W_ih^T + b_ih (+ b_hr/b_hz); only the recurrent
        # matmul is on the serial critical path.  bf16 MXU operands, f32 math.
        gh = jnp.dot(h_prev.astype(jnp.bfloat16), whh_ref[...],
                     preferred_element_type=jnp.float32)
        r = jax.nn.sigmoid(g[:, :Hp] + gh[:, :Hp])
        z = jax.nn.sigmoid(g[:, Hp:2 * Hp] + gh[:, Hp:2 * Hp])
        n = jnp.tanh(g[:, 2 * Hp:] + r * (gh[:, 2 * Hp:] + bhh_n))
        return (1.0 - z) * n + z * h_prev

    @pl.loop(0, T)
    def _(t):
        tb = T - 1 - t
        g_f = gi_ref[pl.ds(t * B_tile, B_tile), :3 * Hp]                 # (B_tile, 3*Hp)
        g_b = gi_ref[pl.ds(tb * B_tile, B_tile), 3 * Hp:]
        hf_new = cell(g_f, h_f[...], whh_f_ref, bhh_n_f)
        hb_new = cell(g_b, h_b[...], whh_b_ref, bhh_n_b)
        h_f[...] = hf_new
        h_b[...] = hb_new
        # Single fused (T, B, 2*Hp) output: forward half / backward half, both
        # lane-aligned (Hp is a multiple of 128).  Dropout applied at write time.
        out_ref[t, :, :Hp] = maybe_drop(hf_new, t, 0)
        out_ref[tb, :, Hp:] = maybe_drop(hb_new, tb, Hp)


def _bigru_pallas(x_tm, params, Hp, B_tile, apply_dropout, seed):
    T, B_pad, I = x_tm.shape
    grid = (B_pad // B_tile,)
    kernel = functools.partial(_bigru_kernel, apply_dropout=apply_dropout)

    # Rough VMEM budget (double-buffered in/out tiles + weights + scratch),
    # clamped to v7x's 64 MiB physical VMEM.
    est = (2 * T * B_tile * I * 2                     # x tile, bf16, double-buffered
           + 2 * T * B_tile * 2 * Hp * 4              # out tile, f32, double-buffered
           + (I * 6 * Hp + 2 * Hp * 3 * Hp) * 2       # weights, bf16
           + 8 * Hp * 4                               # biases
           + T * B_tile * 6 * Hp * 4                  # gi scratch
           + 2 * B_tile * Hp * 4)                     # h state
    vmem_limit = int(min(64 * 1024 * 1024, max(16 * 1024 * 1024, 2 * est)))

    return pl.pallas_call(
        kernel,
        out_shape=jax.ShapeDtypeStruct((T, B_pad, 2 * Hp), jnp.float32),
        grid_spec=pltpu.PrefetchScalarGridSpec(
            num_scalar_prefetch=1,
            grid=grid,
            in_specs=[
                pl.BlockSpec((T, B_tile, I), lambda b, s: (0, b, 0)),     # x (batch-tiled)
                pl.BlockSpec((I, 6 * Hp), lambda b, s: (0, 0)),           # W_ih both dirs
                pl.BlockSpec((Hp, 3 * Hp), lambda b, s: (0, 0)),          # W_hh fwd
                pl.BlockSpec((Hp, 3 * Hp), lambda b, s: (0, 0)),          # W_hh bwd
                pl.BlockSpec((1, 6 * Hp), lambda b, s: (0, 0)),           # folded biases
                pl.BlockSpec((1, 2 * Hp), lambda b, s: (0, 0)),           # b_hn
            ],
            out_specs=pl.BlockSpec((T, B_tile, 2 * Hp), lambda b, s: (0, b, 0)),
            scratch_shapes=[
                pltpu.VMEM((T * B_tile, 6 * Hp), jnp.float32),  # precomputed gi
                pltpu.VMEM((B_tile, Hp), jnp.float32),          # h forward
                pltpu.VMEM((B_tile, Hp), jnp.float32),          # h backward
            ]),
        compiler_params=pltpu.CompilerParams(
            dimension_semantics=("parallel",),   # batch tiles: megacore / v7x 2-TC
            vmem_limit_bytes=vmem_limit),
    )(jnp.asarray([seed], jnp.int32), x_tm,
      params["wih"], params["whh_f"], params["whh_b"],
      params["gib"], params["bhhn"])


# ----------------------------------------------------------------------------
# Parameter layout helpers + module wrapper
# ----------------------------------------------------------------------------
def _pad_gates_cols(w, H, Hp):
    """w: (rows, 3*H) with gate-major columns [r|z|n] -> (rows, 3*Hp), each gate
    padded with zeros to Hp columns so gate slices are lane-aligned."""
    rows = w.shape[0]
    out = jnp.zeros((rows, 3 * Hp), w.dtype)
    for g in range(3):
        out = out.at[:, g * Hp:g * Hp + H].set(w[:, g * H:(g + 1) * H])
    return out


class BidirectionalGRUPallas:
    def __init__(self, input_size, hidden_size, key):
        self.input_size = input_size
        self.hidden_size = hidden_size
        H, I = hidden_size, input_size
        Hp = _round_up(H, 128)           # per-gate lane padding (no-op when H % 128 == 0)
        self.Hp = Hp
        bound = 1.0 / math.sqrt(H)
        ks = jax.random.split(key, 8)

        def u(k, shape):
            return jax.random.uniform(k, shape, jnp.float32, -bound, bound)

        # PyTorch shapes: weight_ih (3H, I), weight_hh (3H, H), biases (3H,), order [r|z|n]
        wih_f, whh_f = u(ks[0], (3 * H, I)), u(ks[1], (3 * H, H))
        bih_f, bhh_f = u(ks[2], (3 * H,)), u(ks[3], (3 * H,))
        wih_b, whh_b = u(ks[4], (3 * H, I)), u(ks[5], (3 * H, H))
        bih_b, bhh_b = u(ks[6], (3 * H,)), u(ks[7], (3 * H,))

        # f32, PyTorch-layout copies kept only for the pure-JAX reference check.
        self.torch_params = dict(wih_f=wih_f, whh_f=whh_f, bih_f=bih_f, bhh_f=bhh_f,
                                 wih_b=wih_b, whh_b=whh_b, bih_b=bih_b, bhh_b=bhh_b)

        # Kernel layout: transposed, gate-padded, bf16 weights for the MXU.
        wih_fp = _pad_gates_cols(wih_f.T, H, Hp)                          # (I, 3Hp)
        wih_bp = _pad_gates_cols(wih_b.T, H, Hp)
        wih = jnp.concatenate([wih_fp, wih_bp], axis=1).astype(jnp.bfloat16)

        def pad_whh(whh):
            w = _pad_gates_cols(whh.T, H, Hp)                             # (H, 3Hp)
            return jnp.zeros((Hp, 3 * Hp), jnp.float32).at[:H].set(w).astype(jnp.bfloat16)

        def pad_bias(b):
            return _pad_gates_cols(b[None, :], H, Hp)[0]                  # (3Hp,)

        bih_fp, bhh_fp = pad_bias(bih_f), pad_bias(bhh_f)
        bih_bp, bhh_bp = pad_bias(bih_b), pad_bias(bhh_b)
        zeros_n = jnp.zeros((Hp,), jnp.float32)
        # Fold b_ih (all gates) + b_hh for r/z into the hoisted projection; b_hn
        # must remain inside r * (W_hn h + b_hn).
        gib_f = bih_fp + jnp.concatenate([bhh_fp[:2 * Hp], zeros_n])
        gib_b = bih_bp + jnp.concatenate([bhh_bp[:2 * Hp], zeros_n])
        gib = jnp.concatenate([gib_f, gib_b])[None, :]                    # (1, 6Hp) f32
        bhhn = jnp.concatenate([bhh_fp[2 * Hp:], bhh_bp[2 * Hp:]])[None, :]  # (1, 2Hp)

        self.params = dict(wih=wih, whh_f=pad_whh(whh_f), whh_b=pad_whh(whh_b),
                           gib=gib, bhhn=bhhn)

    def __call__(self, x, *, training=True, dropout_seed=0):
        # x: (B, T, input_size) -> (B, T, 2*hidden_size)
        B, T, _ = x.shape
        H, Hp = self.hidden_size, self.Hp
        # Batch tiling: sublane-align, and for large B keep VMEM use independent of B.
        B_tile = min(_round_up(B, 8), 128)
        B_pad = _round_up(B, B_tile)
        # TODO(synk): the (B,T)<->(T,B) layout transposes stay as plain XLA copies;
        # the concat / masked-store / dropout passes of the old version are fused away.
        x_tm = jnp.transpose(x, (1, 0, 2)).astype(jnp.bfloat16)           # (T, B, I)
        if B_pad != B:
            x_tm = jnp.pad(x_tm, ((0, 0), (0, B_pad - B), (0, 0)))

        out_tm = _bigru_pallas(x_tm, self.params, Hp, B_tile, training, dropout_seed)
        out = jnp.transpose(out_tm, (1, 0, 2))[:B]                        # (B, T, 2*Hp)
        if Hp == H:
            return out
        # Strip per-gate lane padding (toy shapes only; no-op when H % 128 == 0).
        return jnp.concatenate([out[..., :H], out[..., Hp:Hp + H]], axis=-1)


# ----------------------------------------------------------------------------
# Pure-JAX f32 reference (PyTorch GRU semantics, no dropout)
# ----------------------------------------------------------------------------
def _gru_ref(x, p, H):
    def cell(x_t, h, wih, whh, bih, bhh):
        gi = x_t @ wih.T + bih
        gh = h @ whh.T + bhh
        r = jax.nn.sigmoid(gi[:, :H] + gh[:, :H])
        z = jax.nn.sigmoid(gi[:, H:2 * H] + gh[:, H:2 * H])
        n = jnp.tanh(gi[:, 2 * H:] + r * gh[:, 2 * H:])
        return (1.0 - z) * n + z * h

    B, T, _ = x.shape
    h_f = jnp.zeros((B, H), jnp.float32)
    h_b = jnp.zeros((B, H), jnp.float32)
    outs_f, outs_b = [], [None] * T
    for t in range(T):
        h_f = cell(x[:, t], h_f, p["wih_f"], p["whh_f"], p["bih_f"], p["bhh_f"])
        outs_f.append(h_f)
    for t in range(T - 1, -1, -1):
        h_b = cell(x[:, t], h_b, p["wih_b"], p["whh_b"], p["bih_b"], p["bhh_b"])
        outs_b[t] = h_b
    return jnp.concatenate([jnp.stack(outs_f, 1), jnp.stack(outs_b, 1)], axis=-1)


if __name__ == "__main__":
    B, T, I, H = 2, 8, 16, 32
    key = jax.random.PRNGKey(0)
    k_param, k_x = jax.random.split(key)

    x = jax.random.normal(k_x, (B, T, I), jnp.float32)
    model = BidirectionalGRUPallas(I, H, k_param)

    # Correctness of the recurrence (dropout disabled).  bf16 MXU operands vs the
    # f32 reference -> loose-ish tolerance.
    out_eval = jax.block_until_ready(model(x, training=False))
    ref = _gru_ref(x, model.torch_params, H)
    assert out_eval.shape == (B, T, 2 * H)
    max_err = float(jnp.max(jnp.abs(out_eval - ref)))
    assert max_err < 2e-2, f"GRU kernel mismatch: max abs err {max_err}"

    # Module forward as defined (training-mode Dropout(0.5) fused into the kernel).
    # TODO(synk): dropout mask comes from an in-kernel counter hash, not torch's RNG
    # stream (semantics match: Bernoulli keep p=0.5, scale 2x, deterministic per seed).
    out_train = jax.block_until_ready(model(x, training=True, dropout_seed=123))
    assert out_train.shape == (B, T, 2 * H)
    zero_frac = float(jnp.mean(out_train == 0.0))
    assert 0.25 < zero_frac < 0.75, f"unexpected dropout zero fraction {zero_frac}"

    print("KERNEL_OK")
</pallas_src>

<mosaic_0001>
module attributes {stable_mosaic.version = 11 : i64} {
  func.func @_bigru_kernel(%arg0: i32, %arg1: memref<1xi32, #tpu.memory_space<smem>>, %arg2: memref<8x8x16xbf16, #tpu.memory_space<vmem>>, %arg3: memref<16x768xbf16, #tpu.memory_space<vmem>>, %arg4: memref<128x384xbf16, #tpu.memory_space<vmem>>, %arg5: memref<128x384xbf16, #tpu.memory_space<vmem>>, %arg6: memref<1x768xf32, #tpu.memory_space<vmem>>, %arg7: memref<1x256xf32, #tpu.memory_space<vmem>>, %arg8: memref<8x8x256xf32, #tpu.memory_space<vmem>>, %arg9: memref<64x768xf32, #tpu.memory_space<vmem>>, %arg10: memref<8x128xf32, #tpu.memory_space<vmem>>, %arg11: memref<8x128xf32, #tpu.memory_space<vmem>>) attributes {dimension_semantics = [#tpu.dimension_semantics<parallel>], iteration_bounds = array<i64: 1>, scalar_prefetch = 1 : i64, scratch_operands = 3 : i64, tpu.core_type = #tpu.core_type<tc>, window_params = [{transform_indices = @transform_0, window_bounds = array<i64: 8, 8, 16>}, {pipeline_mode = #tpu.pipeline_mode<synchronous>, transform_indices = @transform_1, window_bounds = array<i64: 16, 768>}, {pipeline_mode = #tpu.pipeline_mode<synchronous>, transform_indices = @transform_2, window_bounds = array<i64: 128, 384>}, {pipeline_mode = #tpu.pipeline_mode<synchronous>, transform_indices = @transform_3, window_bounds = array<i64: 128, 384>}, {pipeline_mode = #tpu.pipeline_mode<synchronous>, transform_indices = @transform_4, window_bounds = array<i64: 1, 768>}, {pipeline_mode = #tpu.pipeline_mode<synchronous>, transform_indices = @transform_5, window_bounds = array<i64: 1, 256>}, {transform_indices = @transform_6, window_bounds = array<i64: 8, 8, 256>}]} {
    %c0 = arith.constant 0 : index
    %c0_0 = arith.constant 0 : index
    %c0_1 = arith.constant 0 : index
    %0 = vector.load %arg2[%c0, %c0_0, %c0_1] : memref<8x8x16xbf16, #tpu.memory_space<vmem>>, vector<8x8x16xbf16>
    %1 = vector.shape_cast %0 : vector<8x8x16xbf16> to vector<64x16xbf16>
    %c0_2 = arith.constant 0 : index
    %c0_3 = arith.constant 0 : index
    %2 = vector.load %arg3[%c0_2, %c0_3] : memref<16x768xbf16, #tpu.memory_space<vmem>>, vector<16x768xbf16>
    %cst = arith.constant dense<0.000000e+00> : vector<64x768xf32>
    %3 = tpu.matmul %1, %2, %cst {dimension_numbers = #tpu.dot_dimension_numbers<[1], [0], [0], [1], [0, 0, 1, 1], [], []>} : vector<64x16xbf16>, vector<16x768xbf16>, vector<64x768xf32> -> vector<64x768xf32>
    %c0_4 = arith.constant 0 : index
    %c0_5 = arith.constant 0 : index
    %4 = vector.load %arg6[%c0_4, %c0_5] : memref<1x768xf32, #tpu.memory_space<vmem>>, vector<1x768xf32>
    %5 = vector.broadcast %4 : vector<1x768xf32> to vector<64x768xf32>
    %6 = arith.addf %3, %5 : vector<64x768xf32>
    %c0_6 = arith.constant 0 : index
    %c0_7 = arith.constant 0 : index
    %7 = vector.load %arg9[%c0_6, %c0_7] : memref<64x768xf32, #tpu.memory_space<vmem>>, vector<64x768xf32>
    tpu.vector_store %arg9[%c0_6, %c0_7], %6 {strides = array<i32>} : memref<64x768xf32, #tpu.memory_space<vmem>>, vector<64x768xf32>,
    %cst_8 = arith.constant 0.000000e+00 : f32
    %8 = vector.broadcast %cst_8 : f32 to vector<8x128xf32>
    %c0_9 = arith.constant 0 : index
    %c0_10 = arith.constant 0 : index
    %9 = vector.load %arg10[%c0_9, %c0_10] : memref<8x128xf32, #tpu.memory_space<vmem>>, vector<8x128xf32>
    tpu.vector_store %arg10[%c0_9, %c0_10], %8 {strides = array<i32>} : memref<8x128xf32, #tpu.memory_space<vmem>>, vector<8x128xf32>,
    %cst_11 = arith.constant 0.000000e+00 : f32
    %10 = vector.broadcast %cst_11 : f32 to vector<8x128xf32>
    %c0_12 = arith.constant 0 : index
    %c0_13 = arith.constant 0 : index
    %11 = vector.load %arg11[%c0_12, %c0_13] : memref<8x128xf32, #tpu.memory_space<vmem>>, vector<8x128xf32>
    tpu.vector_store %arg11[%c0_12, %c0_13], %10 {strides = array<i32>} : memref<8x128xf32, #tpu.memory_space<vmem>>, vector<8x128xf32>,
    %c0_14 = arith.constant 0 : index
    %c0_15 = arith.constant 0 : index
    %12 = vector.load %arg7[%c0_14, %c0_15] : memref<1x256xf32, #tpu.memory_space<vmem>>, vector<1x128xf32>
    %c0_16 = arith.constant 0 : index
    %c128 = arith.constant 128 : index
    %13 = vector.load %arg7[%c0_16, %c128] : memref<1x256xf32, #tpu.memory_space<vmem>>, vector<1x128xf32>
    %c0_i32 = arith.constant 0 : i32
    %c8_i32 = arith.constant 8 : i32
    %14 = arith.addi %c0_i32, %c8_i32 : i32
    %c1_i32 = arith.constant 1 : i32
    scf.for %arg12 = %c0_i32 to %14 step %c1_i32  : i32 {
      %c1_i32_18 = arith.constant 1 : i32
      %15 = arith.muli %arg12, %c1_i32_18 : i32
      %c0_i32_19 = arith.constant 0 : i32
      %16 = arith.addi %c0_i32_19, %15 : i32
      %c7_i32 = arith.constant 7 : i32
      %17 = arith.subi %c7_i32, %16 : i32
      %c8_i32_20 = arith.constant 8 : i32
      %18 = arith.muli %16, %c8_i32_20 : i32
      %19 = arith.index_cast %18 : i32 to index
      %c0_21 = arith.constant 0 : index
      %20 = vector.load %arg9[%19, %c0_21] : memref<64x768xf32, #tpu.memory_space<vmem>>, vector<8x384xf32>
      %c8_i32_22 = arith.constant 8 : i32
      %21 = arith.muli %17, %c8_i32_22 : i32
      %22 = arith.index_cast %21 : i32 to index
      %c384 = arith.constant 384 : index
      %23 = vector.load %arg9[%22, %c384] : memref<64x768xf32, #tpu.memory_space<vmem>>, vector<8x384xf32>
      %c0_23 = arith.constant 0 : index
      %c0_24 = arith.constant 0 : index
      %24 = vector.load %arg10[%c0_23, %c0_24] : memref<8x128xf32, #tpu.memory_space<vmem>>, vector<8x128xf32>
      %25 = arith.truncf %24 : vector<8x128xf32> to vector<8x128xbf16>
      %c0_25 = arith.constant 0 : index
      %c0_26 = arith.constant 0 : index
      %26 = vector.load %arg4[%c0_25, %c0_26] : memref<128x384xbf16, #tpu.memory_space<vmem>>, vector<128x384xbf16>
      %cst_27 = arith.constant dense<0.000000e+00> : vector<8x384xf32>
      %27 = tpu.matmul %25, %26, %cst_27 {dimension_numbers = #tpu.dot_dimension_numbers<[1], [0], [0], [1], [0, 0, 1, 1], [], []>} : vector<8x128xbf16>, vector<128x384xbf16>, vector<8x384xf32> -> vector<8x384xf32>
      %28 = vector.extract_strided_slice %20 {offsets = [0, 0], sizes = [8, 128], strides = [1, 1]} : vector<8x384xf32> to vector<8x128xf32>
      %29 = vector.extract_strided_slice %27 {offsets = [0, 0], sizes = [8, 128], strides = [1, 1]} : vector<8x384xf32> to vector<8x128xf32>
      %30 = arith.addf %28, %29 : vector<8x128xf32>
      %31 = arith.negf %30 : vector<8x128xf32>
      %32 = math.exp %31 : vector<8x128xf32>
      %cst_28 = arith.constant 1.000000e+00 : f32
      %33 = vector.broadcast %cst_28 : f32 to vector<8x128xf32>
      %34 = arith.addf %33, %32 : vector<8x128xf32>
      %35 = arith.divf %33, %34 : vector<8x128xf32>
      %36 = vector.extract_strided_slice %20 {offsets = [0, 128], sizes = [8, 128], strides = [1, 1]} : vector<8x384xf32> to vector<8x128xf32>
      %37 = vector.extract_strided_slice %27 {offsets = [0, 128], sizes = [8, 128], strides = [1, 1]} : vector<8x384xf32> to vector<8x128xf32>
      %38 = arith.addf %36, %37 : vector<8x128xf32>
      %39 = arith.negf %38 : vector<8x128xf32>
      %40 = math.exp %39 : vector<8x128xf32>
      %cst_29 = arith.constant 1.000000e+00 : f32
      %41 = vector.broadcast %cst_29 : f32 to vector<8x128xf32>
      %42 = arith.addf %41, %40 : vector<8x128xf32>
      %43 = arith.divf %41, %42 : vector<8x128xf32>
      %44 = vector.extract_strided_slice %20 {offsets = [0, 256], sizes = [8, 128], strides = [1, 1]} : vector<8x384xf32> to vector<8x128xf32>
      %45 = vector.extract_strided_slice %27 {offsets = [0, 256], sizes = [8, 128], strides = [1, 1]} : vector<8x384xf32> to vector<8x128xf32>
      %46 = vector.broadcast %12 : vector<1x128xf32> to vector<8x128xf32>
      %47 = arith.addf %45, %46 : vector<8x128xf32>
      %48 = arith.mulf %35, %47 : vector<8x128xf32>
      %49 = arith.addf %44, %48 : vector<8x128xf32>
      %50 = math.tanh %49 : vector<8x128xf32>
      %cst_30 = arith.constant 1.000000e+00 : f32
      %51 = vector.broadcast %cst_30 : f32 to vector<8x128xf32>
      %52 = arith.subf %51, %43 : vector<8x128xf32>
      %53 = arith.mulf %52, %50 : vector<8x128xf32>
      %54 = arith.mulf %43, %24 : vector<8x128xf32>
      %55 = arith.addf %53, %54 : vector<8x128xf32>
      %c0_31 = arith.constant 0 : index
      %c0_32 = arith.constant 0 : index
      %56 = vector.load %arg11[%c0_31, %c0_32] : memref<8x128xf32, #tpu.memory_space<vmem>>, vector<8x128xf32>
      %57 = arith.truncf %56 : vector<8x128xf32> to vector<8x128xbf16>
      %c0_33 = arith.constant 0 : index
      %c0_34 = arith.constant 0 : index
      %58 = vector.load %arg5[%c0_33, %c0_34] : memref<128x384xbf16, #tpu.memory_space<vmem>>, vector<128x384xbf16>
      %cst_35 = arith.constant dense<0.000000e+00> : vector<8x384xf32>
      %59 = tpu.matmul %57, %58, %cst_35 {dimension_numbers = #tpu.dot_dimension_numbers<[1], [0], [0], [1], [0, 0, 1, 1], [], []>} : vector<8x128xbf16>, vector<128x384xbf16>, vector<8x384xf32> -> vector<8x384xf32>
      %60 = vector.extract_strided_slice %23 {offsets = [0, 0], sizes = [8, 128], strides = [1, 1]} : vector<8x384xf32> to vector<8x128xf32>
      %61 = vector.extract_strided_slice %59 {offsets = [0, 0], sizes = [8, 128], strides = [1, 1]} : vector<8x384xf32> to vector<8x128xf32>
      %62 = arith.addf %60, %61 : vector<8x128xf32>
      %63 = arith.negf %62 : vector<8x128xf32>
      %64 = math.exp %63 : vector<8x128xf32>
      %cst_36 = arith.constant 1.000000e+00 : f32
      %65 = vector.broadcast %cst_36 : f32 to vector<8x128xf32>
      %66 = arith.addf %65, %64 : vector<8x128xf32>
      %67 = arith.divf %65, %66 : vector<8x128xf32>
      %68 = vector.extract_strided_slice %23 {offsets = [0, 128], sizes = [8, 128], strides = [1, 1]} : vector<8x384xf32> to vector<8x128xf32>
      %69 = vector.extract_strided_slice %59 {offsets = [0, 128], sizes = [8, 128], strides = [1, 1]} : vector<8x384xf32> to vector<8x128xf32>
      %70 = arith.addf %68, %69 : vector<8x128xf32>
      %71 = arith.negf %70 : vector<8x128xf32>
      %72 = math.exp %71 : vector<8x128xf32>
      %cst_37 = arith.constant 1.000000e+00 : f32
      %73 = vector.broadcast %cst_37 : f32 to vector<8x128xf32>
      %74 = arith.addf %73, %72 : vector<8x128xf32>
      %75 = arith.divf %73, %74 : vector<8x128xf32>
      %76 = vector.extract_strided_slice %23 {offsets = [0, 256], sizes = [8, 128], strides = [1, 1]} : vector<8x384xf32> to vector<8x128xf32>
      %77 = vector.extract_strided_slice %59 {offsets = [0, 256], sizes = [8, 128], strides = [1, 1]} : vector<8x384xf32> to vector<8x128xf32>
      %78 = vector.broadcast %13 : vector<1x128xf32> to vector<8x128xf32>
      %79 = arith.addf %77, %78 : vector<8x128xf32>
      %80 = arith.mulf %67, %79 : vector<8x128xf32>
      %81 = arith.addf %76, %80 : vector<8x128xf32>
      %82 = math.tanh %81 : vector<8x128xf32>
      %cst_38 = arith.constant 1.000000e+00 : f32
      %83 = vector.broadcast %cst_38 : f32 to vector<8x128xf32>
      %84 = arith.subf %83, %75 : vector<8x128xf32>
      %85 = arith.mulf %84, %82 : vector<8x128xf32>
      %86 = arith.mulf %75, %56 : vector<8x128xf32>
      %87 = arith.addf %85, %86 : vector<8x128xf32>
      %c0_39 = arith.constant 0 : index
      %c0_40 = arith.constant 0 : index
      %88 = vector.load %arg10[%c0_39, %c0_40] : memref<8x128xf32, #tpu.memory_space<vmem>>, vector<8x128xf32>
      tpu.vector_store %arg10[%c0_39, %c0_40], %55 {strides = array<i32>} : memref<8x128xf32, #tpu.memory_space<vmem>>, vector<8x128xf32>,
      %c0_41 = arith.constant 0 : index
      %c0_42 = arith.constant 0 : index
      %89 = vector.load %arg11[%c0_41, %c0_42] : memref<8x128xf32, #tpu.memory_space<vmem>>, vector<8x128xf32>
      tpu.vector_store %arg11[%c0_41, %c0_42], %87 {strides = array<i32>} : memref<8x128xf32, #tpu.memory_space<vmem>>, vector<8x128xf32>,
      %90 = arith.index_cast %16 : i32 to index
      %c0_43 = arith.constant 0 : index
      %c0_44 = arith.constant 0 : index
      %91 = vector.load %arg8[%90, %c0_43, %c0_44] : memref<8x8x256xf32, #tpu.memory_space<vmem>>, vector<1x8x128xf32>
      %92 = vector.shape_cast %91 : vector<1x8x128xf32> to vector<8x128xf32>
      %93 = vector.shape_cast %55 : vector<8x128xf32> to vector<1x8x128xf32>
      tpu.vector_store %arg8[%90, %c0_43, %c0_44], %93 {strides = array<i32>} : memref<8x8x256xf32, #tpu.memory_space<vmem>>, vector<1x8x128xf32>,
      %94 = arith.index_cast %17 : i32 to index
      %c0_45 = arith.constant 0 : index
      %c128_46 = arith.constant 128 : index
      %95 = vector.load %arg8[%94, %c0_45, %c128_46] : memref<8x8x256xf32, #tpu.memory_space<vmem>>, vector<1x8x128xf32>
      %96 = vector.shape_cast %95 : vector<1x8x128xf32> to vector<8x128xf32>
      %97 = vector.shape_cast %87 : vector<8x128xf32> to vector<1x8x128xf32>
      tpu.vector_store %arg8[%94, %c0_45, %c128_46], %97 {strides = array<i32>} : memref<8x8x256xf32, #tpu.memory_space<vmem>>, vector<1x8x128xf32>,
    }
    %c8_i32_17 = arith.constant 8 : i32
    return
  }
  func.func @transform_0(%arg0: i32, %arg1: memref<1xi32, #tpu.memory_space<smem>>) -> (i32, i32, i32) {
    %c0_i32 = arith.constant 0 : i32
    %c0_i32_0 = arith.constant 0 : i32
    %c0_i32_1 = arith.constant 0 : i32
    return %c0_i32, %arg0, %c0_i32_0 : i32, i32, i32
  }
  func.func @transform_1(%arg0: i32, %arg1: memref<1xi32, #tpu.memory_space<smem>>) -> (i32, i32) {
    %c0_i32 = arith.constant 0 : i32
    %c0_i32_0 = arith.constant 0 : i32
    %c0_i32_1 = arith.constant 0 : i32
    return %c0_i32, %c0_i32_0 : i32, i32
  }
  func.func @transform_2(%arg0: i32, %arg1: memref<1xi32, #tpu.memory_space<smem>>) -> (i32, i32) {
    %c0_i32 = arith.constant 0 : i32
    %c0_i32_0 = arith.constant 0 : i32
    %c0_i32_1 = arith.constant 0 : i32
    return %c0_i32, %c0_i32_0 : i32, i32
  }
  func.func @transform_3(%arg0: i32, %arg1: memref<1xi32, #tpu.memory_space<smem>>) -> (i32, i32) {
    %c0_i32 = arith.constant 0 : i32
    %c0_i32_0 = arith.constant 0 : i32
    %c0_i32_1 = arith.constant 0 : i32
    return %c0_i32, %c0_i32_0 : i32, i32
  }
  func.func @transform_4(%arg0: i32, %arg1: memref<1xi32, #tpu.memory_space<smem>>) -> (i32, i32) {
    %c0_i32 = arith.constant 0 : i32
    %c0_i32_0 = arith.constant 0 : i32
    %c0_i32_1 = arith.constant 0 : i32
    return %c0_i32, %c0_i32_0 : i32, i32
  }
  func.func @transform_5(%arg0: i32, %arg1: memref<1xi32, #tpu.memory_space<smem>>) -> (i32, i32) {
    %c0_i32 = arith.constant 0 : i32
    %c0_i32_0 = arith.constant 0 : i32
    %c0_i32_1 = arith.constant 0 : i32
    return %c0_i32, %c0_i32_0 : i32, i32
  }
  func.func @transform_6(%arg0: i32, %arg1: memref<1xi32, #tpu.memory_space<smem>>) -> (i32, i32, i32) {
    %c0_i32 = arith.constant 0 : i32
    %c0_i32_0 = arith.constant 0 : i32
    %c0_i32_1 = arith.constant 0 : i32
    return %c0_i32, %arg0, %c0_i32_0 : i32, i32, i32
  }
}

</mosaic_0001>

<bundles_post_ra>
// kernel: tpu_custom_call.1
= control target key start
LH: loop header
LB: loop body
LE: loop exit
PB: predicated region body
PF: predicated region fallthrough
CT: control target
= control target key end

     0   :  { %13 = vsyncpa [#allocation8], 0  ;;  %s1742_s0 = inlined_call_operand.<no memory space> [shape: s32[1], index: 0, kind: input, shape index: {}]   ;;  %s1743_s1 = inlined_call_operand.hbm [shape: bf16[8,8,16], index: 1, kind: input, shape index: {}]   ;;  %s1744_s2 = inlined_call_operand.hbm [shape: bf16[16,768], index: 2, kind: input, shape index: {}]   ;;  %s1745_s3 = inlined_call_operand.hbm [shape: bf16[128,384], index: 3, kind: input, shape index: {}]   ;;  %s1746_s4 = inlined_call_operand.hbm [shape: bf16[128,384], index: 4, kind: input, shape index: {}]   ;;  %s1747_s5 = inlined_call_operand.hbm [shape: f32[1,768], index: 5, kind: input, shape index: {}]   ;;  %s1748_s6 = inlined_call_operand.vmem [shape: f32[1,256], index: 6, kind: input, shape index: {}]   ;;  %s1749_s7 = inlined_call_operand.hbm [shape: f32[8,8,256], index: 7, kind: output, shape index: {}]  }
   0x1   :  { %14 = vsyncpa [#allocation11], 0 }
   0x2   :  { %15 = vsyncpa [#allocation14], 0  ;;  %s34_s25 = sshll.u32 %s1744_s2, 4  ;;  %s35_s25 = int_to_ptr.hbm [resolvable:$true] %s34_s25 }
   0x3   :  { %16 = vsyncpa [#allocation9], 0  ;;  %s1528_s26 = smov [#allocation10]   ;;  %s1529_s28 = smov 384  }
   0x4   :  { %s36_s27 = sshll.u32 %s1528_s26, 4  ;;  %s1530_s29 = smov 24   ;;  %s37_s27 = int_to_ptr.vmem [resolvable:$true] %s36_s27 }
   0x5   :  { %42 = dma.hbm_to_vmem [thread:$0]  %s35_s25, 768, %s37_s27, [#allocation11], %s1529_s28, %s1529_s28, %s1530_s29  }
   0x6   :  { %s60_s9 = sshll.u32 %s1746_s4, 4  ;;  %s1531_s10 = smov [#allocation13]   ;;  %s61_s9 = int_to_ptr.hbm [resolvable:$true] %s60_s9 }
   0x7   :  { %s62_s11 = sshll.u32 %s1531_s10, 4  ;;  %s21_s14 = sshll.u32 %s1743_s1, 4  ;;  %s63_s11 = int_to_ptr.vmem [resolvable:$true] %s62_s11  ;;  %s22_s14 = int_to_ptr.hbm [resolvable:$true] %s21_s14 }
   0x8   :  { %s1532_s2 = smov 192   ;;  %s1533_s15 = smov 12  }
   0x9   :  { %68 = dma.hbm_to_vmem [thread:$0]  %s61_s9, 3072, %s63_s11, [#allocation14], %s1532_s2, %s1532_s2, %s1533_s15  }
   0xa   :  { %s1534_s16 = smov [#allocation7]   ;;  %s47_s20 = sshll.u32 %s1745_s3, 4  ;;  %s48_s20 = int_to_ptr.hbm [resolvable:$true] %s47_s20 }
   0xb   :  { %s23_s17 = sshll.u32 %s1534_s16, 4  ;;  %s1535_s4 = smov 64   ;;  %s24_s17 = int_to_ptr.vmem [resolvable:$true] %s23_s17 }
   0xc   :  { %s1536_s21 = smov 4   ;;  %s1537_s22 = smov [#allocation12]  }
   0xd   :  { %29 = dma.hbm_to_vmem [thread:$0]  %s22_s14, 512, %s24_s17, [#allocation8], %s1535_s4, %s1535_s4, %s1536_s21  }
   0xe   :  { %s49_s0 = sshll.u32 %s1537_s22, 4  ;;  %s74_s24 = sshll.u32 %s1747_s5, 4  ;;  %s50_s0 = int_to_ptr.vmem [resolvable:$true] %s49_s0  ;;  %s75_s24 = int_to_ptr.hbm [resolvable:$true] %s74_s24 }
   0xf   :  { %55 = dma.hbm_to_vmem [thread:$0]  %s48_s20, 3072, %s50_s0, [#allocation11], %s1532_s2, %s1532_s2, %s1533_s15  }
  0x10   :  { %s1538_s25 = smov [#allocation15]  }
  0x11   :  { %s76_s26 = sshll.u32 %s1538_s25, 4  ;;  %s77_s26 = int_to_ptr.vmem [resolvable:$true] %s76_s26 }
  0x12   :  { %79 = dma.hbm_to_vmem [thread:$0]  %s75_s24, 96, %s77_s26, [#allocation14]  }
  0x13   :  { %1516 = dma.done.wait [#allocation8], 512  }
  0x14   :  { %1517 = vsyncadd [#allocation8], 4294966784 }
  0x15   :  { %1518 = dma.done.wait [#allocation11], 3840  }
  0x16   :  { %1519 = vsyncadd [#allocation11], 4294963456 }
  0x17   :  { %1520 = dma.done.wait [#allocation14], 3168  }
  0x18   :  { %1521 = vsyncadd [#allocation14], 4294964128  ;;  %v1539_v0 = vmov 0.0   ;;  %v1601_v1 = vld [vmem:[%s1748_s6] sm:$0x1]  ;;  %v1261_v9 = vld [vmem:[#allocation7] sm:$0xff] }
  0x19   :  { %416 = vst [vmem:[#allocation3] sm:$0xff] %v1539_v0  ;;  %v1606_v2 = vld [vmem:[%s1748_s6 + $0x1] sm:$0x1]  ;;  %v1011_v3 = vld [vmem:[#allocation10] sm:$0xf]  ;;  %vm181_vm0 = vcmask 130048  }
  0x1a   :  { %417 = vst [vmem:[#allocation4] sm:$0xff] %v1539_v0  ;;  %v1268_v4 = vld [vmem:[#allocation10 + $0x14] sm:$0xf0]  ;;  %v1265_v5 = vld [vmem:[#allocation10 + $0x4] sm:$0xf]  ;;  %v1263_v10 = vld [vmem:[#allocation7 + $0x10] sm:$0xff] }
  0x1b   :  { %v1013_v6 = vld [vmem:[#allocation10 + $0x18] sm:$0xf0]  ;;  %v1012_v7 = vor.u32 %v1268_v4, %v1011_v3  ;;  %v1019_v11 = vld [vmem:[#allocation10 + $0x8] sm:$0xf]  ;;  %v1269_v12 = vld [vmem:[#allocation10 + $0x1c] sm:$0xf0] }
  0x1c   :  { %v1016_v8 = vor.u32 %v1265_v5, %v1013_v6  ;;  %v1266_v13 = vld [vmem:[#allocation10 + $0xc] sm:$0xf]  ;;  %v1021_v14 = vld [vmem:[#allocation10 + $0x20] sm:$0xf0]  ;;  %v1020_v15 = vor.u32 %v1269_v12, %v1019_v11  ;;  %v1027_v17 = vld [vmem:[#allocation10 + $0x10] sm:$0xf] }
  0x1d   :  { %201 = vmatpush.bf16.msra.mxu0 %v1012_v7  ;;  %1323 = vmatpush.bf16.msra.mxu2 %v1012_v7  ;;  %v1024_v16 = vor.u32 %v1266_v13, %v1021_v14  ;;  %v1270_v18 = vld [vmem:[#allocation10 + $0x24] sm:$0xf0]  ;;  %v1267_v19 = vld [vmem:[#allocation10 + $0x14] sm:$0xf]  ;;  %v1029_v21 = vld [vmem:[#allocation10 + $0x28] sm:$0xf0] }
  0x1e   :  { %230 = vmatpush.bf16.msra.mxu1 %v1016_v8  ;;  %1324 = vmatpush.bf16.msra.mxu3 %v1016_v8  ;;  %v1028_v20 = vor.u32 %v1270_v18, %v1027_v17  ;;  %v1032_v22 = vor.u32 %v1267_v19, %v1029_v21  ;;  %v1262_v23 = vld [vmem:[#allocation7 + $0x8] sm:$0xff]  ;;  %v1264_v24 = vld [vmem:[#allocation7 + $0x18] sm:$0xff]  ;;  %v117_v25 = vld [vmem:[#allocation15] sm:$0x3f]  ;;  %s1672_s6 = smov 0  }
  0x1f   :  { %v119_v26 = vperm.slane %v117_v25, 0  ;;  %v120_v27 = vperm.slane %v117_v25, 1  ;;  %v1632_v56 = vperm.slane %v117_v25, 4  ;;  %v1634_v58 = vperm.slane %v117_v25, 5 }
  0x20   :  { %1033 = vmatmul.msk.bf16.vlgmr.msra.gmra.mxu0 %vm181_vm0, %v1261_v9  ;;  %1035 = vmatmul.msk.bf16.vlgmr.msra.gmra.mxu2 %vm181_vm0, %v1263_v10  ;;  %v1638_v4 = vperm.slane %v117_v25, 2  ;;  %v1640_v5 = vperm.slane %v117_v25, 3 }
  0x21   :  { %259 = vmatpush.bf16.msrb.mxu2 %v1020_v15  ;;  %1037 = vmatmul.msk.bf16.vlgmr.msra.gmra.mxu1 %vm181_vm0, %v1261_v9 }
  0x22   :  { %288 = vmatpush.bf16.msrb.mxu3 %v1024_v16  ;;  %317 = vmatpush.bf16.msrb.mxu0 %v1028_v20 }
  0x23   :  { %1039 = vmatmul.msk.bf16.vlgmr.msra.gmra.mxu3 %vm181_vm0, %v1263_v10  ;;  %346 = vmatpush.bf16.msrb.mxu1 %v1032_v22 }
  0x30   :  { %1034 = vmatmul.msk.bf16.gmra.mxu0 %vm181_vm0, %v1262_v23  ;;  %1036 = vmatmul.msk.bf16.gmra.mxu2 %vm181_vm0, %v1264_v24 }
  0x31   :  { %1038 = vmatmul.msk.bf16.gmra.mxu1 %vm181_vm0, %v1262_v23 }
  0x33   :  { %1040 = vmatmul.msk.bf16.gmra.mxu3 %vm181_vm0, %v1264_v24 }
  0x40   :  { %1041 = vmatmul.msk.bf16.vlgmr.msrb.gmra.mxu2 %vm181_vm0, %v1261_v9  ;;  %1049 = vmatmul.msk.bf16.vlgmr.msrb.gmra.mxu0 %vm181_vm0, %v1261_v9 }
  0x41   :  { %1053 = vmatmul.msk.bf16.vlgmr.msrb.gmra.mxu1 %vm181_vm0, %v1261_v9 }
  0x43   :  { %1045 = vmatmul.msk.bf16.vlgmr.msrb.gmra.mxu3 %vm181_vm0, %v1261_v9 }
  0x50   :  { %1042 = vmatmul.msk.bf16.gmra.mxu2 %vm181_vm0, %v1262_v23  ;;  %1050 = vmatmul.msk.bf16.gmra.mxu0 %vm181_vm0, %v1262_v23 }
  0x51   :  { %1054 = vmatmul.msk.bf16.gmra.mxu1 %vm181_vm0, %v1262_v23 }
  0x53   :  { %1046 = vmatmul.msk.bf16.gmra.mxu3 %vm181_vm0, %v1262_v23 }
  0x60   :  { %1043 = vmatmul.msk.bf16.gmra.mxu2 %vm181_vm0, %v1263_v10  ;;  %1051 = vmatmul.msk.bf16.gmra.mxu0 %vm181_vm0, %v1263_v10 }
  0x61   :  { %1055 = vmatmul.msk.bf16.gmra.mxu1 %vm181_vm0, %v1263_v10 }
  0x63   :  { %1047 = vmatmul.msk.bf16.gmra.mxu3 %vm181_vm0, %v1263_v10 }
  0x70   :  { %1044 = vmatmul.msk.bf16.gmra.mxu2 %vm181_vm0, %v1264_v24  ;;  %1052 = vmatmul.msk.bf16.gmra.mxu0 %vm181_vm0, %v1264_v24 }
  0x71   :  { %1056 = vmatmul.msk.bf16.gmra.mxu1 %vm181_vm0, %v1264_v24 }
  0x73   :  { %1048 = vmatmul.msk.bf16.gmra.mxu3 %vm181_vm0, %v1264_v24 }
  0x9d   :  { %v203_v28 = vpop.f32.mrf.mxu0 }
  0x9e   :  { %v204_v29 = vadd.f32 %v203_v28, %v119_v26  ;;  %v232_v30 = vpop.f32.mrf.mxu1 }
  0x9f   :  { %v233_v31 = vadd.f32 %v232_v30, %v120_v27 }
  0xa0   :  { %368 = vst [vmem:[#allocation2] sm:$0xff] %v204_v29 }
  0xa1   :  { %369 = vst [vmem:[#allocation2 + $0x8] sm:$0xff] %v233_v31 }
  0xa3   :  { %v213_v32 = vpop.f32.mrf.mxu2 }
  0xa4   :  { %v214_v33 = vadd.f32 %v213_v32, %v119_v26 }
  0xa5   :  { %v205_v36 = vpop.f32.mrf.mxu0 }
  0xa6   :  { %v242_v34 = vpop.f32.mrf.mxu3  ;;  %392 = vst [vmem:[#allocation2 + $0xc0] sm:$0xff] %v214_v33  ;;  %v206_v37 = vadd.f32 %v205_v36, %v119_v26  ;;  %v234_v38 = vpop.f32.mrf.mxu1 }
  0xa7   :  { %v243_v35 = vadd.f32 %v242_v34, %v120_v27  ;;  %v235_v39 = vadd.f32 %v234_v38, %v120_v27 }
  0xa8   :  { %374 = vst [vmem:[#allocation2 + $0x30] sm:$0xff] %v206_v37 }
  0xa9   :  { %393 = vst [vmem:[#allocation2 + $0xc8] sm:$0xff] %v243_v35 }
  0xaa   :  { %375 = vst [vmem:[#allocation2 + $0x38] sm:$0xff] %v235_v39 }
  0xab   :  { %v215_v40 = vpop.f32.mrf.mxu2 }
  0xac   :  { %v216_v41 = vadd.f32 %v215_v40, %v119_v26 }
  0xad   :  { %v208_v44 = vpop.f32.mrf.mxu0 }
  0xae   :  { %v244_v42 = vpop.f32.mrf.mxu3  ;;  %398 = vst [vmem:[#allocation2 + $0xf0] sm:$0xff] %v216_v41  ;;  %v209_v45 = vadd.f32 %v208_v44, %v119_v26  ;;  %v237_v46 = vpop.f32.mrf.mxu1 }
  0xaf   :  { %v245_v43 = vadd.f32 %v244_v42, %v120_v27  ;;  %v238_v47 = vadd.f32 %v237_v46, %v120_v27 }
  0xb0   :  { %380 = vst [vmem:[#allocation2 + $0x60] sm:$0xff] %v209_v45 }
  0xb1   :  { %399 = vst [vmem:[#allocation2 + $0xf8] sm:$0xff] %v245_v43 }
  0xb2   :  { %381 = vst [vmem:[#allocation2 + $0x68] sm:$0xff] %v238_v47 }
  0xb3   :  { %v218_v48 = vpop.f32.mrf.mxu2 }
  0xb4   :  { %v219_v49 = vadd.f32 %v218_v48, %v119_v26 }
  0xb5   :  { %v210_v52 = vpop.f32.mrf.mxu0 }
  0xb6   :  { %v247_v50 = vpop.f32.mrf.mxu3  ;;  %404 = vst [vmem:[#allocation2 + $0x120] sm:$0xff] %v219_v49  ;;  %v211_v53 = vadd.f32 %v210_v52, %v119_v26  ;;  %v239_v54 = vpop.f32.mrf.mxu1 }
  0xb7   :  { %v248_v51 = vadd.f32 %v247_v50, %v120_v27  ;;  %v240_v55 = vadd.f32 %v239_v54, %v120_v27 }
  0xb8   :  { %386 = vst [vmem:[#allocation2 + $0x90] sm:$0xff] %v211_v53 }
  0xb9   :  { %405 = vst [vmem:[#allocation2 + $0x128] sm:$0xff] %v248_v51 }
  0xba   :  { %387 = vst [vmem:[#allocation2 + $0x98] sm:$0xff] %v240_v55 }
  0xbb   :  { %v220_v57 = vpop.f32.mrf.mxu2 }
  0xbc   :  { %v221_v59 = vadd.f32 %v220_v57, %v119_v26 }
  0xbd   :  { %v319_v62 = vpop.f32.mrf.mxu0 }
  0xbe   :  { %v249_v60 = vpop.f32.mrf.mxu3  ;;  %410 = vst [vmem:[#allocation2 + $0x150] sm:$0xff] %v221_v59  ;;  %v320_v63 = vadd.f32 %v319_v62, %v1632_v56  ;;  %v348_v0 = vpop.f32.mrf.mxu1 }
  0xbf   :  { %v250_v61 = vadd.f32 %v249_v60, %v120_v27  ;;  %v349_v3 = vadd.f32 %v348_v0, %v1634_v58 }
  0xc0   :  { %372 = vst [vmem:[#allocation2 + $0x20] sm:$0xff] %v320_v63 }
  0xc1   :  { %411 = vst [vmem:[#allocation2 + $0x158] sm:$0xff] %v250_v61 }
  0xc2   :  { %373 = vst [vmem:[#allocation2 + $0x28] sm:$0xff] %v349_v3 }
  0xc3   :  { %v261_v6 = vpop.f32.mrf.mxu2 }
  0xc4   :  { %v262_v7 = vadd.f32 %v261_v6, %v1638_v4 }
  0xc5   :  { %v321_v10 = vpop.f32.mrf.mxu0 }
  0xc6   :  { %v290_v8 = vpop.f32.mrf.mxu3  ;;  %370 = vst [vmem:[#allocation2 + $0x10] sm:$0xff] %v262_v7  ;;  %v322_v11 = vadd.f32 %v321_v10, %v1632_v56  ;;  %v350_v12 = vpop.f32.mrf.mxu1 }
  0xc7   :  { %v291_v9 = vadd.f32 %v290_v8, %v1640_v5  ;;  %v351_v13 = vadd.f32 %v350_v12, %v1634_v58 }
  0xc8   :  { %378 = vst [vmem:[#allocation2 + $0x50] sm:$0xff] %v322_v11 }
  0xc9   :  { %371 = vst [vmem:[#allocation2 + $0x18] sm:$0xff] %v291_v9 }
  0xca   :  { %379 = vst [vmem:[#allocation2 + $0x58] sm:$0xff] %v351_v13 }
  0xcb   :  { %v263_v14 = vpop.f32.mrf.mxu2 }
  0xcc   :  { %v264_v15 = vadd.f32 %v263_v14, %v1638_v4 }
  0xcd   :  { %v324_v18 = vpop.f32.mrf.mxu0 }
  0xce   :  { %v292_v16 = vpop.f32.mrf.mxu3  ;;  %376 = vst [vmem:[#allocation2 + $0x40] sm:$0xff] %v264_v15  ;;  %v325_v19 = vadd.f32 %v324_v18, %v1632_v56  ;;  %v353_v20 = vpop.f32.mrf.mxu1 }
  0xcf   :  { %v293_v17 = vadd.f32 %v292_v16, %v1640_v5  ;;  %v354_v21 = vadd.f32 %v353_v20, %v1634_v58 }
  0xd0   :  { %384 = vst [vmem:[#allocation2 + $0x80] sm:$0xff] %v325_v19 }
  0xd1   :  { %377 = vst [vmem:[#allocation2 + $0x48] sm:$0xff] %v293_v17 }
  0xd2   :  { %385 = vst [vmem:[#allocation2 + $0x88] sm:$0xff] %v354_v21 }
  0xd3   :  { %v266_v22 = vpop.f32.mrf.mxu2 }
  0xd4   :  { %v267_v23 = vadd.f32 %v266_v22, %v1638_v4 }
  0xd5   :  { %v326_v26 = vpop.f32.mrf.mxu0 }
  0xd6   :  { %v295_v24 = vpop.f32.mrf.mxu3  ;;  %382 = vst [vmem:[#allocation2 + $0x70] sm:$0xff] %v267_v23  ;;  %v327_v27 = vadd.f32 %v326_v26, %v1632_v56  ;;  %v355_v28 = vpop.f32.mrf.mxu1 }
  0xd7   :  { %v296_v25 = vadd.f32 %v295_v24, %v1640_v5  ;;  %v356_v29 = vadd.f32 %v355_v28, %v1634_v58 }
  0xd8   :  { %390 = vst [vmem:[#allocation2 + $0xb0] sm:$0xff] %v327_v27 }
  0xd9   :  { %383 = vst [vmem:[#allocation2 + $0x78] sm:$0xff] %v296_v25 }
  0xda   :  { %391 = vst [vmem:[#allocation2 + $0xb8] sm:$0xff] %v356_v29 }
  0xdb   :  { %v268_v30 = vpop.f32.mrf.mxu2 }
  0xdc   :  { %v269_v31 = vadd.f32 %v268_v30, %v1638_v4 }
  0xdd   :  { %v329_v34 = vpop.f32.mrf.mxu0 }
  0xde   :  { %v297_v32 = vpop.f32.mrf.mxu3  ;;  %388 = vst [vmem:[#allocation2 + $0xa0] sm:$0xff] %v269_v31  ;;  %v330_v35 = vadd.f32 %v329_v34, %v1632_v56  ;;  %v358_v36 = vpop.f32.mrf.mxu1 }
  0xdf   :  { %v298_v33 = vadd.f32 %v297_v32, %v1640_v5  ;;  %v359_v37 = vadd.f32 %v358_v36, %v1634_v58 }
  0xe0   :  { %396 = vst [vmem:[#allocation2 + $0xe0] sm:$0xff] %v330_v35 }
  0xe1   :  { %389 = vst [vmem:[#allocation2 + $0xa8] sm:$0xff] %v298_v33 }
  0xe2   :  { %397 = vst [vmem:[#allocation2 + $0xe8] sm:$0xff] %v359_v37 }
  0xe3   :  { %v271_v38 = vpop.f32.mrf.mxu2 }
  0xe4   :  { %v272_v39 = vadd.f32 %v271_v38, %v1638_v4 }
  0xe5   :  { %v331_v42 = vpop.f32.mrf.mxu0 }
  0xe6   :  { %v300_v40 = vpop.f32.mrf.mxu3  ;;  %394 = vst [vmem:[#allocation2 + $0xd0] sm:$0xff] %v272_v39  ;;  %v332_v43 = vadd.f32 %v331_v42, %v1632_v56  ;;  %v360_v44 = vpop.f32.mrf.mxu1 }
  0xe7   :  { %v301_v41 = vadd.f32 %v300_v40, %v1640_v5  ;;  %v361_v45 = vadd.f32 %v360_v44, %v1634_v58 }
  0xe8   :  { %402 = vst [vmem:[#allocation2 + $0x110] sm:$0xff] %v332_v43 }
  0xe9   :  { %395 = vst [vmem:[#allocation2 + $0xd8] sm:$0xff] %v301_v41 }
  0xea   :  { %403 = vst [vmem:[#allocation2 + $0x118] sm:$0xff] %v361_v45 }
  0xeb   :  { %v273_v46 = vpop.f32.mrf.mxu2 }
  0xec   :  { %v274_v47 = vadd.f32 %v273_v46, %v1638_v4 }
  0xed   :  { %v334_v50 = vpop.f32.mrf.mxu0 }
  0xee   :  { %v302_v48 = vpop.f32.mrf.mxu3  ;;  %400 = vst [vmem:[#allocation2 + $0x100] sm:$0xff] %v274_v47  ;;  %v335_v51 = vadd.f32 %v334_v50, %v1632_v56  ;;  %v363_v52 = vpop.f32.mrf.mxu1 }
  0xef   :  { %v303_v49 = vadd.f32 %v302_v48, %v1640_v5  ;;  %v364_v53 = vadd.f32 %v363_v52, %v1634_v58 }
  0xf0   :  { %408 = vst [vmem:[#allocation2 + $0x140] sm:$0xff] %v335_v51 }
  0xf1   :  { %401 = vst [vmem:[#allocation2 + $0x108] sm:$0xff] %v303_v49 }
  0xf2   :  { %409 = vst [vmem:[#allocation2 + $0x148] sm:$0xff] %v364_v53 }
  0xf3   :  { %v276_v54 = vpop.f32.mrf.mxu2 }
  0xf4   :  { %v277_v55 = vadd.f32 %v276_v54, %v1638_v4 }
  0xf5   :  { %v336_v60 = vpop.f32.mrf.mxu0 }
  0xf6   :  { %v305_v57 = vpop.f32.mrf.mxu3  ;;  %406 = vst [vmem:[#allocation2 + $0x130] sm:$0xff] %v277_v55  ;;  %v337_v61 = vadd.f32 %v336_v60, %v1632_v56  ;;  %v365_v62 = vpop.f32.mrf.mxu1 }
  0xf7   :  { %v306_v59 = vadd.f32 %v305_v57, %v1640_v5  ;;  %v366_v63 = vadd.f32 %v365_v62, %v1634_v58 }
  0xf8   :  { %414 = vst [vmem:[#allocation2 + $0x170] sm:$0xff] %v337_v61 }
  0xf9   :  { %407 = vst [vmem:[#allocation2 + $0x138] sm:$0xff] %v306_v59 }
  0xfa   :  { %415 = vst [vmem:[#allocation2 + $0x178] sm:$0xff] %v366_v63 }
  0xfb   :  { %v278_v0 = vpop.f32.mrf.mxu2 }
  0xfc   :  { %v279_v3 = vadd.f32 %v278_v0, %v1638_v4 }
  0xfe   :  { %v307_v6 = vpop.f32.mrf.mxu3  ;;  %412 = vst [vmem:[#allocation2 + $0x160] sm:$0xff] %v279_v3 }
  0xff   :  { %v308_v7 = vadd.f32 %v307_v6, %v1640_v5 }
 0x101   :  { %413 = vst [vmem:[#allocation2 + $0x168] sm:$0xff] %v308_v7 }
 0x102 LB: > { %v1147_v56 = vld [vmem:[#allocation12 + $0xa8] sm:$0xf]  ;;  %v1295_v8 = vld [vmem:[#allocation12 + $0xb0] sm:$0xf0]  ;;  %v1135_v11 = vld [vmem:[#allocation12 + $0x90] sm:$0xf]  ;;  %s1526_s6 = sphi %s1672_s6, %s425_s6  }
 0x103   : > { %v1245_v58 = vld [vmem:[#allocation13 + $0xa8] sm:$0xf]  ;;  %v1148_v9 = vor.u32 %v1295_v8, %v1147_v56  ;;  %v1319_v10 = vld [vmem:[#allocation13 + $0xb0] sm:$0xf0]  ;;  %v1292_v12 = vld [vmem:[#allocation12 + $0x98] sm:$0xf0] }
 0x104   : > { %v1246_v4 = vor.u32 %v1319_v10, %v1245_v58  ;;  %v1233_v13 = vld [vmem:[#allocation13 + $0x90] sm:$0xf]  ;;  %v1316_v14 = vld [vmem:[#allocation13 + $0x98] sm:$0xf0]  ;;  %v1294_v5 = vld [vmem:[#allocation12 + $0xac] sm:$0xf]  ;;  %v1136_v15 = vor.u32 %v1292_v12, %v1135_v11 }
 0x105   : > { %607 = vmatpush.bf16.msra.mxu0 %v1148_v9  ;;  %v1149_v16 = vld [vmem:[#allocation12 + $0xb4] sm:$0xf0]  ;;  %v1234_v17 = vor.u32 %v1316_v14, %v1233_v13  ;;  %v1289_v20 = vld [vmem:[#allocation12 + $0x80] sm:$0xf0]  ;;  %v1291_v21 = vld [vmem:[#allocation12 + $0x94] sm:$0xf] }
 0x106   : > { %859 = vmatpush.bf16.msra.mxu3 %v1246_v4  ;;  %v1152_v18 = vor.u32 %v1294_v5, %v1149_v16  ;;  %v1123_v19 = vld [vmem:[#allocation12 + $0x78] sm:$0xf]  ;;  %v1313_v23 = vld [vmem:[#allocation13 + $0x80] sm:$0xf0]  ;;  %v1137_v24 = vld [vmem:[#allocation12 + $0x9c] sm:$0xf0] }
 0x107   : > { %v1221_v22 = vld [vmem:[#allocation13 + $0x78] sm:$0xf]  ;;  %v1140_v25 = vor.u32 %v1291_v21, %v1137_v24  ;;  %v1124_v26 = vor.u32 %v1289_v20, %v1123_v19  ;;  %v1288_v27 = vld [vmem:[#allocation12 + $0x7c] sm:$0xf]  ;;  %v1125_v28 = vld [vmem:[#allocation12 + $0x84] sm:$0xf0] }
 0x108   : > { %620 = vmatpush.bf16.msra.mxu1 %v1152_v18  ;;  %v1222_v29 = vor.u32 %v1313_v23, %v1221_v22  ;;  %v1111_v30 = vld [vmem:[#allocation12 + $0x60] sm:$0xf]  ;;  %v1286_v31 = vld [vmem:[#allocation12 + $0x68] sm:$0xf0]  ;;  %v1128_v34 = vor.u32 %v1288_v27, %v1125_v28  ;;  %v1285_v35 = vld [vmem:[#allocation12 + $0x64] sm:$0xf] }
 0x109   : > { %608 = vmatpush.bf16.msra.mxu0 %v1136_v15  ;;  %v1209_v32 = vld [vmem:[#allocation13 + $0x60] sm:$0xf]  ;;  %v1310_v33 = vld [vmem:[#allocation13 + $0x68] sm:$0xf0]  ;;  %v1112_v36 = vor.u32 %v1286_v31, %v1111_v30  ;;  %v1113_v37 = vld [vmem:[#allocation12 + $0x6c] sm:$0xf0] }
 0x10a   : > { %860 = vmatpush.bf16.msra.mxu3 %v1234_v17  ;;  %v1155_v38 = vld [vmem:[#allocation12 + $0xb0] sm:$0xf]  ;;  %v1296_v39 = vld [vmem:[#allocation12 + $0xb8] sm:$0xf0]  ;;  %v1210_v40 = vor.u32 %v1310_v33, %v1209_v32  ;;  %v1099_v41 = vld [vmem:[#allocation12 + $0x48] sm:$0xf]  ;;  %v1116_v46 = vor.u32 %v1285_v35, %v1113_v37 }
 0x10b   : > { %v1283_v42 = vld [vmem:[#allocation12 + $0x50] sm:$0xf0]  ;;  %v1156_v43 = vor.u32 %v1296_v39, %v1155_v38  ;;  %v1197_v44 = vld [vmem:[#allocation13 + $0x48] sm:$0xf]  ;;  %v1143_v47 = vld [vmem:[#allocation12 + $0x98] sm:$0xf] }
 0x10c   : > { %621 = vmatpush.bf16.msra.mxu1 %v1140_v25  ;;  %v1307_v45 = vld [vmem:[#allocation13 + $0x50] sm:$0xf0]  ;;  %v1293_v48 = vld [vmem:[#allocation12 + $0xa0] sm:$0xf0]  ;;  %v1100_v49 = vor.u32 %v1283_v42, %v1099_v41  ;;  %v1282_v50 = vld [vmem:[#allocation12 + $0x4c] sm:$0xf] }
 0x10d   : > { %609 = vmatpush.bf16.msra.mxu0 %v1124_v26  ;;  %633 = vmatpush.bf16.msra.mxu2 %v1156_v43  ;;  %v1101_v51 = vld [vmem:[#allocation12 + $0x54] sm:$0xf0]  ;;  %v1144_v52 = vor.u32 %v1293_v48, %v1143_v47  ;;  %v1198_v53 = vor.u32 %v1307_v45, %v1197_v44  ;;  %v1087_v54 = vld [vmem:[#allocation12 + $0x30] sm:$0xf]  ;;  %v1280_v55 = vld [vmem:[#allocation12 + $0x38] sm:$0xf0] }
 0x10e   : > { %861 = vmatpush.bf16.msra.mxu3 %v1222_v29  ;;  %v1185_v57 = vld [vmem:[#allocation13 + $0x30] sm:$0xf]  ;;  %v1304_v59 = vld [vmem:[#allocation13 + $0x38] sm:$0xf0]  ;;  %v1131_v60 = vld [vmem:[#allocation12 + $0x80] sm:$0xf]  ;;  %v1104_v62 = vor.u32 %v1282_v50, %v1101_v51  ;;  %v1088_v0 = vor.u32 %v1280_v55, %v1087_v54 }
 0x10f   : > { %v1290_v61 = vld [vmem:[#allocation12 + $0x88] sm:$0xf0]  ;;  %v1075_v3 = vld [vmem:[#allocation12 + $0x18] sm:$0xf]  ;;  %v1279_v6 = vld [vmem:[#allocation12 + $0x34] sm:$0xf]  ;;  %v1186_v56 = vor.u32 %v1304_v59, %v1185_v57 }
 0x110   : > { %622 = vmatpush.bf16.msra.mxu1 %v1128_v34  ;;  %v1132_v63 = vor.u32 %v1290_v61, %v1131_v60  ;;  %v1089_v7 = vld [vmem:[#allocation12 + $0x3c] sm:$0xf0]  ;;  %v1277_v8 = vld [vmem:[#allocation12 + $0x20] sm:$0xf0]  ;;  %v1119_v58 = vld [vmem:[#allocation12 + $0x68] sm:$0xf] }
 0x111   : > { %610 = vmatpush.bf16.msra.mxu0 %v1112_v36  ;;  %634 = vmatpush.bf16.msra.mxu2 %v1144_v52  ;;  %v1287_v9 = vld [vmem:[#allocation12 + $0x70] sm:$0xf0]  ;;  %v1173_v10 = vld [vmem:[#allocation13 + $0x18] sm:$0xf]  ;;  %v1301_v11 = vld [vmem:[#allocation13 + $0x20] sm:$0xf0]  ;;  %v1092_v12 = vor.u32 %v1279_v6, %v1089_v7  ;;  %v1076_v14 = vor.u32 %v1277_v8, %v1075_v3 }
 0x112   : > { %862 = vmatpush.bf16.msra.mxu3 %v1210_v40  ;;  %v1276_v4 = vld [vmem:[#allocation12 + $0x1c] sm:$0xf]  ;;  %v1120_v13 = vor.u32 %v1287_v9, %v1119_v58  ;;  %v1077_v5 = vld [vmem:[#allocation12 + $0x24] sm:$0xf0]  ;;  %v1107_v15 = vld [vmem:[#allocation12 + $0x50] sm:$0xf]  ;;  %v1174_v17 = vor.u32 %v1301_v11, %v1173_v10 }
 0x113   : > { %v1284_v16 = vld [vmem:[#allocation12 + $0x58] sm:$0xf0]  ;;  %v1063_v18 = vld [vmem:[#allocation12] sm:$0xf]  ;;  %v1274_v19 = vld [vmem:[#allocation12 + $0x8] sm:$0xf0]  ;;  %v1080_v24 = vor.u32 %v1276_v4, %v1077_v5 }
 0x114   : > { %623 = vmatpush.bf16.msra.mxu1 %v1116_v46  ;;  %v1161_v20 = vld [vmem:[#allocation13] sm:$0xf]  ;;  %v1298_v21 = vld [vmem:[#allocation13 + $0x8] sm:$0xf0]  ;;  %v1247_v23 = vld [vmem:[#allocation13 + $0xb4] sm:$0xf0]  ;;  %v1108_v26 = vor.u32 %v1284_v16, %v1107_v15  ;;  %v1064_v27 = vor.u32 %v1274_v19, %v1063_v18 }
 0x115   : > { %611 = vmatpush.bf16.msra.mxu0 %v1100_v49  ;;  %635 = vmatpush.bf16.msra.mxu2 %v1132_v63  ;;  %v1318_v22 = vld [vmem:[#allocation13 + $0xac] sm:$0xf]  ;;  %v1677_v25 = vld [vmem:[#allocation3] sm:$0xff]  ;;  %v1065_v30 = vld [vmem:[#allocation12 + $0xc] sm:$0xf0]  ;;  %v1162_v31 = vor.u32 %v1298_v21, %v1161_v20  ;;  %s1057_s29 = sshll.u32 %s1526_s6, 3 }
 0x116   : > { %863 = vmatpush.bf16.msra.mxu3 %v1198_v53  ;;  %v1679_v28 = vld [vmem:[#allocation4] sm:$0xff]  ;;  %v1273_v29 = vld [vmem:[#allocation12 + $0x4] sm:$0xf]  ;;  %v1250_v32 = vor.u32 %v1318_v22, %v1247_v23  ;;  %v1315_v33 = vld [vmem:[#allocation13 + $0x94] sm:$0xf]  ;;  %v446_v39 = vpack.c.bf16 %v1677_v25, %v1677_v25  ;;  %s428_s30 = sshra.s32 %s1057_s29, 3 }
 0x117   : > { %v1253_v34 = vld [vmem:[#allocation13 + $0xb0] sm:$0xf]  ;;  %v1320_v35 = vld [vmem:[#allocation13 + $0xb8] sm:$0xf0]  ;;  %v1235_v36 = vld [vmem:[#allocation13 + $0x9c] sm:$0xf0]  ;;  %v1068_v40 = vor.u32 %v1273_v29, %v1065_v30  ;;  %v1685_v41 = vpack.c.bf16 %v1679_v28, %v1679_v28 }
 0x118   : > { %624 = vmatpush.bf16.msra.mxu1 %v1104_v62  ;;  %v1095_v37 = vld [vmem:[#allocation12 + $0x38] sm:$0xf]  ;;  %v1281_v38 = vld [vmem:[#allocation12 + $0x40] sm:$0xf0]  ;;  %v1254_v42 = vor.u32 %v1320_v35, %v1253_v34  ;;  %v1238_v43 = vor.u32 %v1315_v33, %v1235_v36  ;;  %v1312_v44 = vld [vmem:[#allocation13 + $0x7c] sm:$0xf] }
 0x119   : > { %612 = vmatpush.bf16.msra.mxu0 %v1088_v0  ;;  %636 = vmatpush.bf16.msra.mxu2 %v1120_v13  ;;  %v1241_v45 = vld [vmem:[#allocation13 + $0x98] sm:$0xf]  ;;  %v1317_v46 = vld [vmem:[#allocation13 + $0xa0] sm:$0xf0]  ;;  %v1096_v47 = vor.u32 %v1281_v38, %v1095_v37  ;;  %v1223_v48 = vld [vmem:[#allocation13 + $0x84] sm:$0xf0] }
 0x11a   : > { %864 = vmatpush.bf16.msra.mxu3 %v1186_v56  ;;  %v1083_v49 = vld [vmem:[#allocation12 + $0x20] sm:$0xf]  ;;  %v1278_v50 = vld [vmem:[#allocation12 + $0x28] sm:$0xf0]  ;;  %v1242_v51 = vor.u32 %v1317_v46, %v1241_v45  ;;  %v1226_v52 = vor.u32 %v1312_v44, %v1223_v48  ;;  %v1309_v53 = vld [vmem:[#allocation13 + $0x64] sm:$0xf] }
 0x11b   : > { %v1229_v54 = vld [vmem:[#allocation13 + $0x80] sm:$0xf]  ;;  %v1314_v55 = vld [vmem:[#allocation13 + $0x88] sm:$0xf0]  ;;  %v1084_v57 = vor.u32 %v1278_v50, %v1083_v49  ;;  %v1211_v59 = vld [vmem:[#allocation13 + $0x6c] sm:$0xf0] }
 0x11c   : > { %625 = vmatpush.bf16.msra.mxu1 %v1092_v12  ;;  %v1071_v60 = vld [vmem:[#allocation12 + $0x8] sm:$0xf]  ;;  %v1275_v61 = vld [vmem:[#allocation12 + $0x10] sm:$0xf0]  ;;  %v1230_v62 = vor.u32 %v1314_v55, %v1229_v54  ;;  %v1214_v63 = vor.u32 %v1309_v53, %v1211_v59  ;;  %v1306_v7 = vld [vmem:[#allocation13 + $0x4c] sm:$0xf] }
 0x11d   : > { %613 = vmatpush.bf16.msra.mxu0 %v1076_v14  ;;  %637 = vmatpush.bf16.msra.mxu2 %v1108_v26  ;;  %v1217_v0 = vld [vmem:[#allocation13 + $0x68] sm:$0xf]  ;;  %v1311_v3 = vld [vmem:[#allocation13 + $0x70] sm:$0xf0]  ;;  %v1072_v6 = vor.u32 %v1275_v61, %v1071_v60  ;;  %v1199_v56 = vld [vmem:[#allocation13 + $0x54] sm:$0xf0] }
 0x11e   : > { %865 = vmatpush.bf16.msra.mxu3 %v1174_v17  ;;  %v1218_v8 = vor.u32 %v1311_v3, %v1217_v0  ;;  %v1202_v58 = vor.u32 %v1306_v7, %v1199_v56  ;;  %v1205_v9 = vld [vmem:[#allocation13 + $0x50] sm:$0xf]  ;;  %v1308_v10 = vld [vmem:[#allocation13 + $0x58] sm:$0xf0]  ;;  %v1303_v11 = vld [vmem:[#allocation13 + $0x34] sm:$0xf] }
 0x11f   : > { %v1187_v12 = vld [vmem:[#allocation13 + $0x3c] sm:$0xf0]  ;;  %v1206_v4 = vor.u32 %v1308_v10, %v1205_v9  ;;  %v1193_v14 = vld [vmem:[#allocation13 + $0x38] sm:$0xf]  ;;  %v1305_v5 = vld [vmem:[#allocation13 + $0x40] sm:$0xf0] }
 0x120   : > { %626 = vmatpush.bf16.msra.mxu1 %v1080_v24  ;;  %v1190_v13 = vor.u32 %v1303_v11, %v1187_v12  ;;  %v1300_v15 = vld [vmem:[#allocation13 + $0x1c] sm:$0xf]  ;;  %v1175_v16 = vld [vmem:[#allocation13 + $0x24] sm:$0xf0]  ;;  %v1194_v17 = vor.u32 %v1305_v5, %v1193_v14  ;;  %v1181_v19 = vld [vmem:[#allocation13 + $0x20] sm:$0xf] }
 0x121   : > { %614 = vmatpush.bf16.msra.mxu0 %v1064_v27  ;;  %638 = vmatpush.bf16.msra.mxu2 %v1096_v47  ;;  %v1178_v18 = vor.u32 %v1300_v15, %v1175_v16  ;;  %v1302_v20 = vld [vmem:[#allocation13 + $0x28] sm:$0xf0]  ;;  %v1297_v21 = vld [vmem:[#allocation13 + $0x4] sm:$0xf]  ;;  %v1163_v22 = vld [vmem:[#allocation13 + $0xc] sm:$0xf0] }
 0x122   : > { %866 = vmatpush.bf16.msra.mxu3 %v1162_v31  ;;  %v1182_v23 = vor.u32 %v1302_v20, %v1181_v19  ;;  %v1166_v24 = vor.u32 %v1297_v21, %v1163_v22  ;;  %v1169_v26 = vld [vmem:[#allocation13 + $0x8] sm:$0xf]  ;;  %v1299_v27 = vld [vmem:[#allocation13 + $0x10] sm:$0xf0]  ;;  %s426_s8 = ssub.s32 7, %s1526_s6  ;;  %s1271_s9 = smul.u32 48, %s428_s30 }
 0x123   : > { %v1170_v29 = vor.u32 %v1299_v27, %v1169_v26  ;;  %s1059_s10 = sshll.u32 %s426_s8, 3  ;;  %v687_v55 = vperm.slane %v1601_v1, 0  ;;  %s1321_s2 = sshll.u32 %s1526_s6, 4 }
 0x124   : > { %615 = vmatmul.bf16.vlgmr.msra.gmra.mxu0 %v446_v39  ;;  %627 = vmatpush.bf16.msra.mxu1 %v1068_v40  ;;  %s437_s11 = sshra.s32 %s1059_s10, 3  ;;  %s1694_s12 = scalar_lea.vmem [#allocation2], %s1271_s9 }
 0x125   : > { %872 = vmatpush.bf16.msrb.mxu0 %v1250_v32  ;;  %867 = vmatmul.bf16.vlgmr.msra.gmra.mxu3 %v1685_v41  ;;  %v433_v30 = vld [vmem:[%s1694_s12] sm:$0xff]  ;;  %s1272_s13 = smul.u32 48, %s437_s11  ;;  %v434_v33 = vld [vmem:[%s1694_s12 + $0x8] sm:$0xff]  ;;  %v435_v15 = vld [vmem:[%s1694_s12 + $0x10] sm:$0xff]  ;;  %s953_s15 = scalar_lea.vmem [#allocation16], %s1321_s2 }
 0x126   : > { %639 = vmatpush.bf16.msra.mxu2 %v1084_v57  ;;  %s1322_s16 = sshll.u32 %s426_s8, 4  ;;  %s425_s6 = sadd.s32 1, %s1526_s6  }
 0x127   : > { %628 = vmatmul.bf16.vlgmr.msra.gmra.mxu1 %v446_v39  ;;  %s1698_s14 = scalar_lea.vmem [#allocation2], %s1272_s13  ;;  %s957_s17 = scalar_lea.vmem [#allocation16], %s1322_s16 }
 0x128   : > { %885 = vmatpush.bf16.msrb.mxu1 %v1254_v42  ;;  %v442_v37 = vld [vmem:[%s1698_s14 + $0x18] sm:$0xff]  ;;  %p422_p0 = scmp.ge.s32.totalorder %s425_s6, 8  }
 0x129   : > { %873 = vmatpush.bf16.msrb.mxu0 %v1238_v43  ;;  %s965_s20 = sshll.u32 (%p422_p0), %s1749_s7, 4  ;;  %s1540_s4 = smov (%p422_p0), [#allocation16]   ;;  %s966_s20 = int_to_ptr.hbm [resolvable:$true] %s965_s20 }
 0x12a   : > { %640 = vmatpush.bf16.msra.mxu2 %v1072_v6  ;;  %s963_s21 = sshll.u32 (%p422_p0), %s1540_s4, 4  ;;  %s1541_s22 = smov (%p422_p0), 256   ;;  %s964_s21 = int_to_ptr.vmem [resolvable:$true] %s963_s21 }
 0x12b   :  { %s1542_s0 = smov (%p422_p0), 16  }
 0x12c   : > { %886 = vmatpush.bf16.msrb.mxu1 %v1242_v51 }
 0x12d   : > { %874 = vmatpush.bf16.msrb.mxu0 %v1226_v52  ;;  %641 = vmatmul.bf16.vlgmr.msra.gmra.mxu2 %v446_v39 }
 0x130   : > { %887 = vmatpush.bf16.msrb.mxu1 %v1230_v62 }
 0x131   : > { %875 = vmatpush.bf16.msrb.mxu0 %v1214_v63 }
 0x134   : > { %888 = vmatpush.bf16.msrb.mxu1 %v1218_v8 }
 0x135   : > { %876 = vmatpush.bf16.msrb.mxu0 %v1202_v58  ;;  %v443_v58 = vld [vmem:[%s1698_s14 + $0x20] sm:$0xff] }
 0x138   : > { %889 = vmatpush.bf16.msrb.mxu1 %v1206_v4 }
 0x139   : > { %877 = vmatpush.bf16.msrb.mxu0 %v1190_v13 }
 0x13c   : > { %890 = vmatpush.bf16.msrb.mxu1 %v1194_v17 }
 0x13d   : > { %878 = vmatpush.bf16.msrb.mxu0 %v1178_v18 }
 0x140   : > { %891 = vmatpush.bf16.msrb.mxu1 %v1182_v23 }
 0x141   : > { %879 = vmatpush.bf16.msrb.mxu0 %v1166_v24 }
 0x144   : > { %880 = vmatmul.bf16.vlgmr.msrb.gmra.mxu0 %v1685_v41  ;;  %892 = vmatpush.bf16.msrb.mxu1 %v1170_v29 }
 0x147   : > { %893 = vmatmul.bf16.vlgmr.msrb.gmra.mxu1 %v1685_v41 }
 0x1a1   : > { %v616_v31 = vpop.f32.mrf.mxu0 }
 0x1a2   : > { %v646_v32 = vadd.f32 %v616_v31, %v433_v30 }
 0x1a4   : > { %v1157_v34 = vmul.f32 -1.442695, %v646_v32  ;;  %v629_v35 = vpop.f32.mrf.mxu1 }
 0x1a5   : > { %v666_v36 = vadd.f32 %v629_v35, %v434_v33  ;;  %v939_v35 = vperm.slane %v1606_v2, 0 }
 0x1a6   : > { %1348 = vpow2.f32 %v1157_v34 }
 0x1a7   : > { %v1158_v38 = vmul.f32 -1.442695, %v666_v36 }
 0x1a8   : > { %v868_v39 = vpop.f32.mrf.mxu3 }
 0x1a9   : > { %v898_v40 = vadd.f32 %v868_v39, %v442_v37  ;;  %1350 = vpow2.f32 %v1158_v38  ;;  %v618_v41 = vpop.f32.mrf.mxu0 }
 0x1ab   : > { %v1255_v42 = vmul.f32 -1.442695, %v898_v40 }
 0x1ac   : > { %v1349_v43 = vpop.eup %1348  ;;  %v631_v44 = vpop.f32.mrf.mxu1 }
 0x1ad   : > { %v650_v45 = vadd.f32 1.0, %v1349_v43  ;;  %1352 = vpow2.f32 %v1255_v42 }
 0x1af   : > { %v1351_v46 = vpop.eup %1350  ;;  %1354 = vrcp.f32 %v650_v45  ;;  %v662_v54 = vand.u32 2147483648, %v650_v45  ;;  %vm656_vm1 = vweird.f32 %v650_v45  ;;  %v660_v60 = vand.u32 2147483647, %v650_v45 }
 0x1b0   : > { %v670_v47 = vadd.f32 1.0, %v1351_v46  ;;  %v870_v48 = vpop.f32.mrf.mxu3  ;;  %v642_v51 = vpop.f32.mrf.mxu2 }
 0x1b1   : > { %v663_v3 = vor.u32 1.1754944e-38, %v662_v54  ;;  %vm661_vm6 = vcmp.eq.f32.partialorder %v660_v60, 8.507059e+37  ;;  %v689_v8 = vadd.f32 %v687_v55, %v642_v51 }
 0x1b2   : > { %1356 = vrcp.f32 %v670_v47  ;;  %vm676_vm3 = vweird.f32 %v670_v47  ;;  %v682_v7 = vand.u32 2147483648, %v670_v47  ;;  %v680_v11 = vand.u32 2147483647, %v670_v47 }
 0x1b3   : > { %v1353_v49 = vpop.eup %1352 }
 0x1b4   : > { %v1701_v50 = vadd.f32 1.0, %v1353_v49  ;;  %v683_v19 = vor.u32 1.1754944e-38, %v682_v7  ;;  %vm681_vm8 = vcmp.eq.f32.partialorder %v680_v11, 8.507059e+37 }
 0x1b5   : > { %v1355_v52 = vpop.eup %1354 }
 0x1b6   : > { %1358 = vrcp.f32 %v1701_v50  ;;  %v652_v53 = vmul.f32 %v1355_v52, %v650_v45  ;;  %vm657_vm2 = vweird.f32 %v1355_v52  ;;  %vm908_vm9 = vweird.f32 %v1701_v50 }
 0x1b7   : > { %vm1705_vm5 = vmor %vm656_vm1, %vm657_vm2  ;;  %v914_v29 = vand.u32 2147483648, %v1701_v50  ;;  %v912_v31 = vand.u32 2147483647, %v1701_v50 }
 0x1b8   : > { %v1357_v57 = vpop.eup %1356  ;;  %v653_v59 = vsub.f32 1.0, %v652_v53  ;;  %v644_v9 = vpop.f32.mrf.mxu2 }
 0x1b9   : > { %v672_v61 = vmul.f32 %v1357_v57, %v670_v47  ;;  %vm677_vm4 = vweird.f32 %v1357_v57  ;;  %v915_v38 = vor.u32 1.1754944e-38, %v914_v29  ;;  %vm913_vm12 = vcmp.eq.f32.partialorder %v912_v31, 8.507059e+37 }
 0x1ba   : > { %v654_v62 = vmul.f32 %v1355_v52, %v653_v59  ;;  %vm1711_vm7 = vmor %vm676_vm3, %vm677_vm4 }
 0x1bb   : > { %v673_v63 = vsub.f32 1.0, %v672_v61 }
 0x1bc   : > { %v1359_v6 = vpop.eup %1358  ;;  %v655_v56 = vadd.f32 %v1355_v52, %v654_v62 }
 0x1bd   : > { %v674_v10 = vmul.f32 %v1357_v57, %v673_v63  ;;  %v904_v12 = vmul.f32 %v1359_v6, %v1701_v50  ;;  %vm909_vm10 = vweird.f32 %v1359_v6 }
 0x1be   : > { %v659_v13 = vsel %vm1705_vm5, %v1355_v52, %v655_v56  ;;  %vm1723_vm11 = vmor %vm908_vm9, %vm909_vm10 }
 0x1bf   : > { %v675_v5 = vadd.f32 %v1357_v57, %v674_v10  ;;  %v664_v16 = vsel %vm661_vm6, %v663_v3, %v659_v13  ;;  %v905_v18 = vsub.f32 1.0, %v904_v12 }
 0x1c0   : > { %v690_v20 = vmul.f32 %v689_v8, %v664_v16 }
 0x1c1   : > { %v881_v14 = vpop.f32.mrf.mxu0  ;;  %v679_v21 = vsel %vm1711_vm7, %v1357_v57, %v675_v5  ;;  %v906_v26 = vmul.f32 %v1359_v6, %v905_v18 }
 0x1c2   : > { %v918_v17 = vadd.f32 %v881_v14, %v443_v58  ;;  %v691_v24 = vadd.f32 %v690_v20, %v435_v15  ;;  %v684_v27 = vsel %vm681_vm8, %v683_v19, %v679_v21 }
 0x1c3   : > { %v907_v30 = vadd.f32 %v1359_v6, %v906_v26  ;;  %v693_v33 = vsub.f32 1.0, %v684_v27  ;;  %v695_v37 = vmul.f32 %v684_v27, %v1677_v25  ;;  %v444_v25 = vld [vmem:[%s1698_s14 + $0x28] sm:$0xff] }
 0x1c4   : > { %v1256_v22 = vmul.f32 -1.442695, %v918_v17  ;;  %v894_v23 = vpop.f32.mrf.mxu1 }
 0x1c5   : > { %v911_v42 = vsel %vm1723_vm11, %v1359_v6, %v907_v30  ;;  %v941_v44 = vadd.f32 %v939_v35, %v894_v23 }
 0x1c6   : > { %1360 = vpow2.f32 %v1256_v22  ;;  %v916_v46 = vsel %vm913_vm12, %v915_v38, %v911_v42 }
 0x1c7   : > { %1362 = vtanh.f32 %v691_v24  ;;  %v942_v47 = vmul.f32 %v941_v44, %v916_v46 }
 0x1c9   : > { %v883_v32 = vpop.f32.mrf.mxu0  ;;  %v943_v50 = vadd.f32 %v942_v47, %v444_v25 }
 0x1cc   : > { %v1361_v36 = vpop.eup %1360  ;;  %v896_v39 = vpop.f32.mrf.mxu1 }
 0x1cd   : > { %v1363_v40 = vpop.eup %1362  ;;  %v922_v41 = vadd.f32 1.0, %v1361_v36 }
 0x1ce   : > { %v694_v43 = vmul.f32 %v1363_v40, %v693_v33 }
 0x1cf   : > { %1364 = vrcp.f32 %v922_v41  ;;  %v934_v52 = vand.u32 2147483648, %v922_v41  ;;  %v932_v54 = vand.u32 2147483647, %v922_v41  ;;  %vm928_vm14 = vweird.f32 %v922_v41 }
 0x1d0   : > { %v696_v45 = vadd.f32 %v695_v37, %v694_v43  ;;  %1366 = vtanh.f32 %v943_v50 }
 0x1d1   : > { %v935_v57 = vor.u32 1.1754944e-38, %v934_v52  ;;  %vm933_vm0 = vcmp.eq.f32.partialorder %v932_v54, 8.507059e+37 }
 0x1d2   : > { %949 = vst [vmem:[#allocation3] sm:$0xff] %v696_v45 }
 0x1d3   : > { %954 = vst [vmem:[%s953_s15] sm:$0xff] %v696_v45 }
 0x1d5   : > { %v1365_v48 = vpop.eup %1364 }
 0x1d6   : > { %v924_v49 = vmul.f32 %v1365_v48, %v922_v41  ;;  %vm929_vm13 = vweird.f32 %v1365_v48  ;;  %v1367_v62 = vpop.eup %1366 }
 0x1d7   : > { %vm930_vm15 = vmor %vm928_vm14, %vm929_vm13 }
 0x1d8   : > { %v925_v51 = vsub.f32 1.0, %v924_v49 }
 0x1da   : > { %v926_v53 = vmul.f32 %v1365_v48, %v925_v51 }
 0x1dc   : > { %v927_v55 = vadd.f32 %v1365_v48, %v926_v53 }
 0x1de   : > { %v931_v59 = vsel %vm930_vm15, %v1365_v48, %v927_v55 }
 0x1df   : > { %v936_v60 = vsel %vm933_vm0, %v935_v57, %v931_v59 }
 0x1e0   : > { %v945_v61 = vsub.f32 1.0, %v936_v60  ;;  %v947_v0 = vmul.f32 %v936_v60, %v1679_v28 }
 0x1e2   : > { %v946_v63 = vmul.f32 %v1367_v62, %v945_v61 }
 0x1e3   :  { %424 = sbr.rel (!%p422_p0) target bundleno = 258 (0x102), region = 75 }
 0x1e4   : > { %v948_v3 = vadd.f32 %v947_v0, %v946_v63 }
 0x1e6   : > { %950 = vst [vmem:[#allocation4] sm:$0xff] %v948_v3 }
 0x1e7   : > { %958 = vst [vmem:[%s957_s17 + $0x8] sm:$0xff] %v948_v3 }
 0x1e8   :  { %971 = dma.vmem_to_hbm [thread:$0]  %s964_s21, 2048, %s966_s20, [#allocation9], %s1541_s22, %s1541_s22, %s1542_s0  }
 0x1e9   :  { %1522 = dma.done.wait [#allocation9], 2048  }
 0x1ea   :  { %1523 = vsyncadd [#allocation9], 4294965248 }
 0x1eb   :  { %976 = vsyncpa [#allocation8], 1 }
 0x1ec   :  { %977 = vsyncpa [#allocation11], 1 }
 0x1ed   :  { %978 = vsyncpa [#allocation14], 1 }
 0x1ee   :  { %979 = vsyncpa [#allocation9], 1 }

</bundles_post_ra>
